<compile_context>
chip_gen: v6e
topology: v6e:2x2x1
jax: 0.10.0
libtpu: 0.0.40
codegen_flags: <defaults>
</compile_context>

<pallas_src>
import jax
import jax.numpy as jnp
from jax.experimental import pallas as pl
from jax.experimental.pallas import tpu as pltpu


# ---------------------------------------------------------------------------
# Latents: the only computable piece (the code parameter) as a Pallas kernel.
# ---------------------------------------------------------------------------
def _latents_code_kernel(code_ref, out_ref):
    out_ref[...] = code_ref[...]


def latents_forward(code):
    # TODO(synk): Latents.forward() returns undefined (self.mu, self.std);
    # the closest computable forward is returning the latent code itself.
    return pl.pallas_call(
        _latents_code_kernel,
        out_shape=jax.ShapeDtypeStruct(code.shape, code.dtype),
    )(code)


# ---------------------------------------------------------------------------
# Decoder kernel: every spatial extent is tiny (1x1 -> 1x1 -> 2x1 -> 2x1 ->
# 4x2), so each ConvTranspose2d collapses into matmuls on channel-last (B, C)
# matrices.  The C1 contraction (the two big weights w1, w2) is streamed over
# the grid with a VMEM f32 accumulator; the last grid step runs the epilogue.
# ---------------------------------------------------------------------------
def _decoder_kernel(x_ref, w1_ref, w2_ref, b2t_ref, w3_ref, b3_ref,
                    w4s_ref, b4t_ref, out_ref, y2_acc):
    f32 = jnp.float32
    bf16 = jnp.bfloat16
    k = pl.program_id(0)

    @pl.when(k == 0)
    def _init():
        y2_acc[...] = jnp.zeros_like(y2_acc)

    # deconv1 (1x1 kernel on a 1x1 input): matmul + ReLU for this C1 tile.
    # b1 is folded into w1 via the ones column appended to x in the wrapper.
    y1k = jnp.maximum(
        jnp.dot(x_ref[...], w1_ref[...], preferred_element_type=f32), 0.0)

    # deconv2 (2x1 kernel on a 1x1 input): both kh taps packed as (tk, 2*C2);
    # accumulate the partial C1 contraction in VMEM scratch.
    y2_acc[...] += jnp.dot(y1k.astype(bf16), w2_ref[...],
                           preferred_element_type=f32)

    @pl.when(k == pl.num_programs(0) - 1)
    def _finalize():
        b = y2_acc.shape[0]
        c2 = b2t_ref.shape[1] // 2
        y2 = jnp.maximum(y2_acc[...] + b2t_ref[...], 0.0)          # (B, 2*C2)

        # deconv3 (1x1 kernel): stack the two deconv2 output rows along the
        # sublane axis -> single w3 matmul instead of two.
        h = jnp.concatenate([y2[:, :c2], y2[:, c2:]], axis=0)      # (2B, C2)
        z = jnp.maximum(
            jnp.dot(h.astype(bf16), w3_ref[...],
                    preferred_element_type=f32) + b3_ref[...], 0.0)  # (2B, C3)

        # deconv4 (3x2 kernel on a 2x1 input -> 4x2 output): taps pre-placed
        # in a lane-padded (2*C3, OUTP) weight -> one matmul, one full store.
        zc = jnp.concatenate([z[:b], z[b:]], axis=1)               # (B, 2*C3)
        out_ref[...] = jnp.dot(zc.astype(bf16), w4s_ref[...],
                               preferred_element_type=f32) + b4t_ref[...]


def _pick_c1_tile(c1):
    for t in (1024, 512, 256, 128):
        if c1 % t == 0 and c1 // t >= 2:
            return t
    return c1   # fallback: single step, block == full extent


# ---------------------------------------------------------------------------
# One-time parameter repacking (hoisted out of the per-call path).
# PyTorch ConvTranspose2d weight layout: (C_in, C_out, kH, kW).
# ---------------------------------------------------------------------------
def pack_decoder_params(params):
    f32, bf16 = jnp.float32, jnp.bfloat16

    # deconv1 (1x1): fold the bias into the weight via a trailing row
    # (pairs with the ones column appended to x in the wrapper).
    w1 = params["w1"][:, :, 0, 0]                                  # (C0, C1)
    w1p = jnp.concatenate([w1, params["b1"][None, :]], axis=0).astype(bf16)
    c1 = w1.shape[1]

    # deconv2 (2x1): both kh taps side by side -> (C1, 2*C2); tiled bias.
    w2 = jnp.transpose(params["w2"][:, :, :, 0], (0, 2, 1))        # (C1, 2, C2)
    c2 = w2.shape[2]
    w2p = w2.reshape(c1, 2 * c2).astype(bf16)
    b2t = jnp.tile(params["b2"], 2)[None, :].astype(f32)           # (1, 2*C2)

    # deconv3 (1x1).
    w3p = params["w3"][:, :, 0, 0].astype(bf16)                    # (C2, C3)
    b3p = params["b3"][None, :].astype(f32)                        # (1, C3)
    c3 = w3p.shape[1]

    # deconv4 (3x2 on a 2x1 input -> 4x2 output): pre-place the 6 taps of each
    # input row into the flattened (p = oh*2 + ow, c) output frame, lane-padded
    # to a multiple of 128 so the epilogue store is unmasked.
    cout = params["w4"].shape[1]                                   # 2*num_dims
    outp = max(128, ((8 * cout + 127) // 128) * 128)
    taps = jnp.transpose(params["w4"], (0, 2, 3, 1)).reshape(c3, 6 * cout)
    w4s = jnp.zeros((2 * c3, outp), f32)
    w4s = w4s.at[:c3, :6 * cout].set(taps)                         # ih=0 -> p 0..5
    w4s = w4s.at[c3:, 2 * cout:8 * cout].set(taps)                 # ih=1 -> p 2..7
    w4s = w4s.astype(bf16)
    b4t = jnp.zeros((1, outp), f32).at[0, :8 * cout].set(jnp.tile(params["b4"], 8))

    return dict(w1=w1p, w2=w2p, b2=b2t, w3=w3p, b3=b3p, w4=w4s, b4=b4t)


# ---------------------------------------------------------------------------
# Forward wrapper: takes the pre-packed (bf16) parameters.
# ---------------------------------------------------------------------------
def pointnet_decoder_conv_shallow2(x, packed, num_points, num_dims):
    B = x.shape[0]
    f32, bf16 = jnp.float32, jnp.bfloat16
    w1, w2, b2t = packed["w1"], packed["w2"], packed["b2"]
    w3, b3 = packed["w3"], packed["b3"]
    w4s, b4t = packed["w4"], packed["b4"]

    c0p, c1 = w1.shape                 # c0p = C0 + 1 (folded-bias row)
    c2 = b2t.shape[1] // 2
    c3 = w3.shape[1]
    outp = w4s.shape[1]

    # x.view(B, -1, 1, 1) -> channel-last bf16 matrix with a ones column so
    # deconv1's bias rides inside the streamed w1 matmul.
    xf = x.reshape(B, -1).astype(bf16)
    x2 = jnp.concatenate([xf, jnp.ones((B, 1), bf16)], axis=1)     # (B, C0+1)

    tk = _pick_c1_tile(c1)
    nk = c1 // tk

    # Tight scoped-VMEM budget: every block counted double-buffered + scratch,
    # with 30% slack; clamped to [16 MiB, 60 MiB] (v7x-safe, not the full 64).
    est = 2 * (B * c0p * 2 + c0p * tk * 2 + tk * 2 * c2 * 2 + 2 * c2 * 4
               + c2 * c3 * 2 + c3 * 4 + 2 * c3 * outp * 2 + outp * 4
               + B * outp * 4) + B * 2 * c2 * 4
    vmem_limit = int(min(max(est * 13 // 10, 16 * 2 ** 20), 60 * 2 ** 20))

    out = pl.pallas_call(
        _decoder_kernel,
        out_shape=jax.ShapeDtypeStruct((B, outp), f32),
        grid_spec=pltpu.PrefetchScalarGridSpec(
            num_scalar_prefetch=0,
            grid=(nk,),                                  # reduction over C1 tiles
            in_specs=[
                pl.BlockSpec((B, c0p), lambda k: (0, 0)),             # x (+ones)
                pl.BlockSpec((c0p, tk), lambda k: (0, k)),            # w1 streamed
                pl.BlockSpec((tk, 2 * c2), lambda k: (k, 0)),         # w2 streamed
                pl.BlockSpec((1, 2 * c2), lambda k: (0, 0)),          # b2 tiled
                pl.BlockSpec((c2, c3), lambda k: (0, 0)),             # w3
                pl.BlockSpec((1, c3), lambda k: (0, 0)),              # b3
                pl.BlockSpec((2 * c3, outp), lambda k: (0, 0)),       # w4 packed
                pl.BlockSpec((1, outp), lambda k: (0, 0)),            # b4 tiled
            ],
            out_specs=pl.BlockSpec((B, outp), lambda k: (0, 0)),
            scratch_shapes=[pltpu.VMEM((B, 2 * c2), f32)],            # y2 acc
        ),
        compiler_params=pltpu.CompilerParams(
            dimension_semantics=("arbitrary",),          # C1 axis is a reduction
            vmem_limit_bytes=vmem_limit,
        ),
    )(x2, w1, w2, b2t, w3, b3, w4s, b4t)                              # (B, outp)

    # Strip lane padding, then back to the PyTorch NCHW flattening (c, h, w).
    cout = (num_points * num_dims) // 8
    out_nchw = jnp.transpose(out[:, :8 * cout].reshape(B, 8, cout),
                             (0, 2, 1)).reshape(B, -1)
    return out_nchw.reshape(B, num_points, num_dims)


# ---------------------------------------------------------------------------
# Deterministic parameter init (shapes from the module's __init__).
# ---------------------------------------------------------------------------
def init_params(key, bottleneck, c1, c2, c3, num_dims):
    ks = jax.random.split(key, 8)

    def u(k, shape, fan_in):
        bound = 1.0 / float(fan_in) ** 0.5
        return jax.random.uniform(k, shape, jnp.float32, -bound, bound)

    return {
        "w1": u(ks[0], (bottleneck, c1, 1, 1), bottleneck),
        "b1": u(ks[1], (c1,), bottleneck),
        "w2": u(ks[2], (c1, c2, 2, 1), c1 * 2),
        "b2": u(ks[3], (c2,), c1 * 2),
        "w3": u(ks[4], (c2, c3, 1, 1), c2),
        "b3": u(ks[5], (c3,), c2),
        "w4": u(ks[6], (c3, 2 * num_dims, 3, 2), c3 * 6),
        "b4": u(ks[7], (2 * num_dims,), c3 * 6),
    }


# ---------------------------------------------------------------------------
# Pure-JAX f32 reference: direct ConvTranspose2d definition, stride 1, no pad.
# ---------------------------------------------------------------------------
def conv_transpose2d_ref(x, w, b):
    B, Cin, H, W = x.shape
    _, Cout, KH, KW = w.shape
    out = jnp.zeros((B, Cout, H + KH - 1, W + KW - 1), jnp.float32)
    for ih in range(H):
        for iw in range(W):
            for kh in range(KH):
                for kw in range(KW):
                    out = out.at[:, :, ih + kh, iw + kw].add(
                        jnp.einsum("bi,io->bo", x[:, :, ih, iw], w[:, :, kh, kw]))
    return out + b[None, :, None, None]


def reference_forward(x, params, num_points, num_dims):
    B = x.shape[0]
    h = x.reshape(B, -1, 1, 1).astype(jnp.float32)
    h = jax.nn.relu(conv_transpose2d_ref(h, params["w1"], params["b1"]))
    h = jax.nn.relu(conv_transpose2d_ref(h, params["w2"], params["b2"]))
    h = jax.nn.relu(conv_transpose2d_ref(h, params["w3"], params["b3"]))
    h = conv_transpose2d_ref(h, params["w4"], params["b4"])
    return h.reshape(B, num_points, num_dims)


if __name__ == "__main__":
    key = jax.random.PRNGKey(0)
    kc, kx, kp = jax.random.split(key, 3)

    # ---- Latents: pass the code parameter through a Pallas copy kernel ----
    numRows, numCols = 16, 128
    code = jax.random.normal(kc, (numRows, numCols), jnp.float32)
    code_out = jax.block_until_ready(latents_forward(code))
    assert code_out.shape == (numRows, numCols)
    assert bool(jnp.array_equal(code_out, code))

    # ---- Decoder kernel (small, structure-preserving configuration) -------
    B, bottleneck, num_dims = 4, 256, 6
    num_points = 16                      # final view needs 2*nd*4*2 == np*nd
    c1, c2, c3 = 512, 256, 128           # module defaults would be 2048/1024/512

    x = jax.random.normal(kx, (B, bottleneck), jnp.float32)
    params = init_params(kp, bottleneck, c1, c2, c3, num_dims)

    # Repacking hoisted out of the per-call path: pack once, reuse per call.
    packed = jax.block_until_ready(jax.jit(pack_decoder_params)(params))
    fwd = jax.jit(pointnet_decoder_conv_shallow2, static_argnums=(2, 3))

    out = jax.block_until_ready(fwd(x, packed, num_points, num_dims))

    ref = reference_forward(x, params, num_points, num_dims)
    assert out.shape == (B, num_points, num_dims), out.shape
    err = float(jnp.max(jnp.abs(out - ref)))
    # Kernel matmul inputs are bf16 (weights stored bf16, f32 accumulation);
    # the reference is full f32 — tolerance documents that inference-time drift.
    tol = 1e-2 * (1.0 + float(jnp.max(jnp.abs(ref))))
    if err > tol:
        raise AssertionError(f"mismatch vs reference: max abs err = {err}")
    print("KERNEL_OK")
</pallas_src>

<mosaic_0001>
module attributes {stable_mosaic.version = 11 : i64} {
  func.func @_latents_code_kernel(%arg0: memref<16x128xf32, #tpu.memory_space<vmem>>, %arg1: memref<16x128xf32, #tpu.memory_space<vmem>>) attributes {dimension_semantics = [], scalar_prefetch = 0 : i64, scratch_operands = 0 : i64, tpu.core_type = #tpu.core_type<tc>} {
    %c0 = arith.constant 0 : index
    %c0_0 = arith.constant 0 : index
    %0 = vector.load %arg0[%c0, %c0_0] : memref<16x128xf32, #tpu.memory_space<vmem>>, vector<16x128xf32>
    %c0_1 = arith.constant 0 : index
    %c0_2 = arith.constant 0 : index
    %1 = vector.load %arg1[%c0_1, %c0_2] : memref<16x128xf32, #tpu.memory_space<vmem>>, vector<16x128xf32>
    tpu.vector_store %arg1[%c0_1, %c0_2], %0 {strides = array<i32>} : memref<16x128xf32, #tpu.memory_space<vmem>>, vector<16x128xf32>,
    return
  }
}

</mosaic_0001>

<bundles_post_ra>
// kernel: tpu_custom_call.1
= control target key start
LH: loop header
LB: loop body
LE: loop exit
PB: predicated region body
PF: predicated region fallthrough
CT: control target
= control target key end

     0   :  { %6 = vsyncpa [#allocation3], 0  ;;  %s112_s0 = inlined_call_operand.hbm [shape: f32[16,128], index: 0, kind: input, shape index: {}]   ;;  %s113_s1 = inlined_call_operand.hbm [shape: f32[16,128], index: 1, kind: output, shape index: {}]  }
   0x1   :  { %7 = vsyncpa [#allocation4], 0  ;;  %s92_s6 = smov [#allocation2]  }
   0x2   :  { %s13_s7 = sshll.u32 %s92_s6, 4  ;;  %s14_s7 = int_to_ptr.vmem [resolvable:$true] %s13_s7 }
   0x3   :  { %s56_s8 = scalar_lea.vmem %s14_s7, 256  ;;  %p61_p1 = scmp.lt.s32.totalorder %s14_s7, %s14_s7 }
   0x4   :  { %p57_p0 = scmp.ne.s32.totalorder %s14_s7, %s56_s8  ;;  %p62_p2 = scmp.lt.s32.totalorder %s56_s8, %s56_s8 }
   0x6   :  { %p63_p3 = por %p62_p2, %p61_p1 }
   0x8   :  { %p64_p4 = pnand %p63_p3, %p57_p0 }
   0xa   :  { %67 = shalt.err (!%p64_p4)
}
   0xb   :  { %s93_s9 = smov 128   ;;  %s94_s10 = smov 8  }
   0xc   :  { %19 = dma.hbm_to_vmem [thread:$0]  %s112_s0, 256, %s14_s7, [#allocation3], %s93_s9, %s93_s9, %s94_s10  }
   0xd   :  { %88 = dma.done.wait [#allocation3], 256  }
   0xe   :  { %89 = vsyncadd [#allocation3], 4294967040  ;;  %s95_s13 = smov [#allocation5]   ;;  %v23_v0 = vld [vmem:[#allocation2] sm:$0xff]  ;;  %v24_v1 = vld [vmem:[#allocation2 + $0x8] sm:$0xff] }
   0xf   :  { %s32_s14 = sshll.u32 %s95_s13, 4  ;;  %25 = vst [vmem:[#allocation5] sm:$0xff] %v23_v0  ;;  %26 = vst [vmem:[#allocation5 + $0x8] sm:$0xff] %v24_v1  ;;  %s33_s14 = int_to_ptr.vmem [resolvable:$true] %s32_s14 }
  0x10   :  { %s68_s15 = scalar_lea.vmem %s33_s14, 256  ;;  %p73_p6 = scmp.lt.s32.totalorder %s33_s14, %s33_s14 }
  0x11   :  { %p69_p5 = scmp.ne.s32.totalorder %s33_s14, %s68_s15  ;;  %p74_p7 = scmp.lt.s32.totalorder %s68_s15, %s68_s15 }
  0x13   :  { %p75_p8 = por %p74_p7, %p73_p6 }
  0x15   :  { %p76_p9 = pnand %p75_p8, %p69_p5 }
  0x17   :  { %79 = shalt.err (!%p76_p9)
}
  0x18   :  { %38 = dma.vmem_to_hbm [thread:$0]  %s33_s14, 256, %s113_s1, [#allocation4], %s93_s9, %s93_s9, %s94_s10  }
  0x19   :  { %90 = dma.done.wait [#allocation4], 256  }
  0x1a   :  { %91 = vsyncadd [#allocation4], 4294967040 }
  0x1b   :  { %42 = vsyncpa [#allocation3], 1 }
  0x1c   :  { %43 = vsyncpa [#allocation4], 1 }

</bundles_post_ra>
